<compile_context>
chip_gen: v6e
topology: v6e:2x2x1
jax: 0.10.0
libtpu: 0.0.40
codegen_flags: <defaults>
</compile_context>

<pallas_src>
import functools

import jax
import jax.numpy as jnp
from jax.experimental import pallas as pl
from jax.experimental.pallas import tpu as pltpu


def _round_up(x, m):
    return (x + m - 1) // m * m


def _padded_dims(B, C, D):
    """Tile sizes + padded sizes for the teacher matmul (and shared B/C pads)."""
    tm = 256 if B > 256 else _round_up(max(B, 1), 8)
    B_pad = _round_up(B, tm)
    C128 = _round_up(C, 128)
    tn = 512 if C128 > 512 else C128
    C_pad = _round_up(C128, tn)
    tk = 512 if D > 512 else _round_up(max(D, 1), 128)
    D_pad = _round_up(D, tk)
    return tm, tn, tk, B_pad, C_pad, D_pad


# ---------------------------------------------------------------------------
# Kernel 1: tiled teacher matmul (bf16 inputs, f32 accumulate, bias epilogue).
# ---------------------------------------------------------------------------
def _teacher_matmul_kernel(x_ref, w_ref, b_ref, o_ref, acc_ref):
    @pl.when(pl.program_id(2) == 0)
    def _():
        acc_ref[...] = jnp.zeros_like(acc_ref)

    acc_ref[...] += jnp.dot(
        x_ref[...], w_ref[...], preferred_element_type=jnp.float32
    )

    @pl.when(pl.program_id(2) == pl.num_programs(2) - 1)
    def _():
        o_ref[...] = acc_ref[...] + b_ref[...]


def teacher_forward(x_flat, w, b, *, tm, tn, tk, B_pad, C_pad, D_pad):
    B, D = x_flat.shape
    C = w.shape[1]

    x_p = (
        jnp.zeros((B_pad, D_pad), jnp.bfloat16)
        .at[:B, :D]
        .set(x_flat.astype(jnp.bfloat16))
    )
    w_p = (
        jnp.zeros((D_pad, C_pad), jnp.bfloat16)
        .at[:D, :C]
        .set(w.astype(jnp.bfloat16))
    )
    b_p = jnp.zeros((1, C_pad), jnp.float32).at[0, :C].set(b.astype(jnp.float32))

    grid = (B_pad // tm, C_pad // tn, D_pad // tk)
    return pl.pallas_call(
        _teacher_matmul_kernel,
        out_shape=jax.ShapeDtypeStruct((B_pad, C_pad), jnp.float32),
        grid_spec=pltpu.PrefetchScalarGridSpec(
            num_scalar_prefetch=0,
            grid=grid,
            in_specs=[
                pl.BlockSpec((tm, tk), lambda i, j, k: (i, k)),
                pl.BlockSpec((tk, tn), lambda i, j, k: (k, j)),
                pl.BlockSpec((1, tn), lambda i, j, k: (0, j)),
            ],
            out_specs=pl.BlockSpec((tm, tn), lambda i, j, k: (i, j)),
            scratch_shapes=[pltpu.VMEM((tm, tn), jnp.float32)],
        ),
        compiler_params=pltpu.CompilerParams(
            dimension_semantics=("parallel", "parallel", "arbitrary"),
            vmem_limit_bytes=64 * 1024 * 1024,
        ),
    )(x_p, w_p, b_p)


# ---------------------------------------------------------------------------
# Kernel 2: fused loss (log-softmax, KL divergence, optional CE, ratio loss).
# ---------------------------------------------------------------------------
def _distill_loss_kernel(pred_ref, teach_ref, labels_ref, scores_ref, out_ref, *,
                         B, C, N, P, keep_ratio, clf_weight, ratio_weight,
                         distill_weight, dynamic):
    pred = pred_ref[...].astype(jnp.float32)   # [B_pad, C_pad]
    tch = teach_ref[...].astype(jnp.float32)   # [B_pad, C_pad]
    B_pad, C_pad = pred.shape

    col_ids = jax.lax.broadcasted_iota(jnp.int32, (B_pad, C_pad), 1)
    row_ids = jax.lax.broadcasted_iota(jnp.int32, (B_pad, 1), 0)
    col_mask = col_ids < C                                   # [B_pad, C_pad]
    row_mask = (row_ids < B).astype(jnp.float32)             # [B_pad, 1]

    neg_big = jnp.float32(-1e30)
    zp = jnp.where(col_mask, pred, neg_big)
    zt = jnp.where(col_mask, tch, neg_big)

    # student log-softmax
    mp = jnp.max(zp, axis=-1, keepdims=True)
    ep = jnp.exp(zp - mp)
    sp = jnp.sum(ep, axis=-1, keepdims=True)
    lp = (zp - mp) - jnp.log(sp)

    # teacher: probs and log-probs from a single exp pass
    mt = jnp.max(zt, axis=-1, keepdims=True)
    et = jnp.exp(zt - mt)
    st = jnp.sum(et, axis=-1, keepdims=True)
    lt = (zt - mt) - jnp.log(st)
    pt = et * pl.reciprocal(st, approx=True)

    # F.kl_div(lp, lt, reduction='batchmean', log_target=True)
    #   = sum( exp(lt) * (lt - lp) ) / B
    kl_rows = jnp.sum(pt * (lt - lp), axis=-1, keepdims=True)        # [B_pad, 1]
    cls_kl = jnp.sum(kl_rows * row_mask, axis=0, keepdims=True) / B  # [1, 1]

    loss = distill_weight * cls_kl

    # base_criterion(pred, labels): hard-label CE, mean. Statically skipped
    # when clf_weight == 0 (the default), so no dead VPU work / DMA use.
    if clf_weight != 0.0:
        labels = labels_ref[...]                                   # [B_pad, 1]
        onehot = jnp.where(col_mask, (col_ids == labels).astype(jnp.float32), 0.0)
        ce_rows = -jnp.sum(onehot * lp, axis=-1, keepdims=True)    # [B_pad, 1]
        cls_loss = jnp.sum(ce_rows * row_mask, axis=0, keepdims=True) / B
        loss = loss + clf_weight * cls_loss

    # token keep-ratio loss (keep_ratio baked in as static constants)
    pred_loss = jnp.zeros((1, 1), jnp.float32)
    for p in range(P):
        s_p = scores_ref[p]                                        # [B_pad, N_pad]
        r_p = keep_ratio[p]
        row_mean = jnp.sum(s_p, axis=-1, keepdims=True) / N        # [B_pad, 1]
        if dynamic:
            # pos_ratio = score.mean(); loss_p = (pos_ratio - r)^2
            pos_ratio = jnp.sum(row_mean * row_mask, axis=0, keepdims=True) / B
            pred_loss = pred_loss + (pos_ratio - r_p) ** 2
        else:
            # pos_ratio = score.mean(1); loss_p = mean_B (pos_ratio - r)^2
            diff2 = ((row_mean - r_p) ** 2) * row_mask             # [B_pad, 1]
            pred_loss = pred_loss + jnp.sum(diff2, axis=0, keepdims=True) / B

    loss = loss + ratio_weight * pred_loss / P
    out_ref[...] = loss


def distill_diff_pruning_loss(inputs, pred, out_pred_scores, labels,
                              teacher_w, teacher_b, *,
                              keep_ratio=(0.75, 0.5, 0.25),
                              ratio_weight=2.0, distill_weight=0.5,
                              clf_weight=0.0, dynamic=False):
    B, C = pred.shape
    x_flat = inputs.reshape(B, -1)                     # torch .view(B, -1)
    D = x_flat.shape[1]
    P = len(out_pred_scores)
    N = out_pred_scores[0].shape[1]
    assert len(keep_ratio) == P

    tm, tn, tk, B_pad, C_pad, D_pad = _padded_dims(B, C, D)
    N_pad = _round_up(N, 128)

    # teacher runs under torch.no_grad() -> stop_gradient
    cls_t_pad = jax.lax.stop_gradient(
        teacher_forward(x_flat, teacher_w, teacher_b,
                        tm=tm, tn=tn, tk=tk,
                        B_pad=B_pad, C_pad=C_pad, D_pad=D_pad))

    pred_pad = (
        jnp.zeros((B_pad, C_pad), jnp.float32).at[:B, :C].set(pred.astype(jnp.float32))
    )
    labels_pad = (
        jnp.zeros((B_pad, 1), jnp.int32).at[:B, 0].set(labels.astype(jnp.int32))
    )
    scores = jnp.stack([s.astype(jnp.float32) for s in out_pred_scores], axis=0)
    scores_pad = (
        jnp.zeros((P, B_pad, N_pad), jnp.float32).at[:, :B, :N].set(scores)
    )

    kernel = functools.partial(
        _distill_loss_kernel,
        B=B, C=C, N=N, P=P,
        keep_ratio=tuple(float(r) for r in keep_ratio),
        clf_weight=float(clf_weight),
        ratio_weight=float(ratio_weight),
        distill_weight=float(distill_weight),
        dynamic=bool(dynamic),
    )

    # TODO(synk): for very large B / token counts, tile this kernel over B and
    # (ideally) fuse it as an epilogue of the teacher matmul's last K step.
    loss = pl.pallas_call(
        kernel,
        out_shape=jax.ShapeDtypeStruct((1, 1), jnp.float32),
        grid=(1,),
        in_specs=[
            pl.BlockSpec((B_pad, C_pad), lambda i: (0, 0)),
            pl.BlockSpec((B_pad, C_pad), lambda i: (0, 0)),
            pl.BlockSpec((B_pad, 1), lambda i: (0, 0)),
            pl.BlockSpec((P, B_pad, N_pad), lambda i: (0, 0, 0)),
        ],
        out_specs=pl.BlockSpec((1, 1), lambda i: (0, 0)),
        compiler_params=pltpu.CompilerParams(
            vmem_limit_bytes=64 * 1024 * 1024,
        ),
    )(pred_pad, cls_t_pad, labels_pad, scores_pad)

    loss_part = []  # matches the module's (loss, loss_part) return
    return loss[0, 0], loss_part


# ---------------------------------------------------------------------------
# Pure-JAX reference (sanity check of the kernel semantics).
# ---------------------------------------------------------------------------
def _reference(inputs, pred, scores_list, labels, w, b, keep_ratio,
               ratio_weight, distill_weight, clf_weight, dynamic):
    B, C = pred.shape
    x_flat = inputs.reshape(B, -1).astype(jnp.float32)
    cls_t = x_flat @ w + b
    lp = jax.nn.log_softmax(pred.astype(jnp.float32), axis=-1)
    lt = jax.nn.log_softmax(cls_t, axis=-1)
    kl = jnp.sum(jnp.exp(lt) * (lt - lp)) / B
    onehot = jax.nn.one_hot(labels, C, dtype=jnp.float32)
    cls_loss = -jnp.sum(onehot * lp) / B
    pred_loss = 0.0
    for i, s in enumerate(scores_list):
        s = s.astype(jnp.float32)
        pr = s.mean() if dynamic else s.mean(axis=1)
        pred_loss = pred_loss + jnp.mean((pr - keep_ratio[i]) ** 2)
    return (clf_weight * cls_loss
            + ratio_weight * pred_loss / len(keep_ratio)
            + distill_weight * kl)


if __name__ == "__main__":
    key = jax.random.PRNGKey(0)
    k_in, k_pred, k_s0, k_s1, k_s2, k_lab, k_w = jax.random.split(key, 7)

    B, Cin, H, W = 2, 4, 16, 16
    num_classes = 10
    N = 8                      # token count for pruning scores
    keep_ratio = (0.75, 0.5, 0.25)

    inputs = jax.random.normal(k_in, (B, Cin, H, W), dtype=jnp.float32)  # NCHW
    pred = jax.random.normal(k_pred, (B, num_classes), dtype=jnp.float32)
    mask = jnp.ones((B, N), dtype=jnp.float32)  # unused by the forward pass
    out_pred_scores = [
        jax.nn.sigmoid(jax.random.normal(k, (B, N), dtype=jnp.float32))
        for k in (k_s0, k_s1, k_s2)
    ]
    labels = jax.random.randint(k_lab, (B,), 0, num_classes)

    D = Cin * H * W
    teacher_w = 0.02 * jax.random.normal(k_w, (D, num_classes), dtype=jnp.float32)
    teacher_b = jnp.zeros((num_classes,), dtype=jnp.float32)

    loss, loss_part = distill_diff_pruning_loss(
        inputs, pred, out_pred_scores, labels, teacher_w, teacher_b,
        keep_ratio=keep_ratio, ratio_weight=2.0, distill_weight=0.5,
        clf_weight=0.0, dynamic=False,
    )
    loss = jax.block_until_ready(loss)

    ref = _reference(inputs, pred, out_pred_scores, labels, teacher_w,
                     teacher_b, keep_ratio, 2.0, 0.5, 0.0, False)
    ref = jax.block_until_ready(ref)

    assert jnp.allclose(loss, ref, rtol=2e-2, atol=2e-2), (loss, ref)
    print("KERNEL_OK")
</pallas_src>

<mosaic_0001>
module attributes {stable_mosaic.version = 11 : i64} {
  func.func @_teacher_matmul_kernel(%arg0: i32, %arg1: i32, %arg2: i32, %arg3: memref<8x512xbf16, #tpu.memory_space<vmem>>, %arg4: memref<512x128xbf16, #tpu.memory_space<vmem>>, %arg5: memref<1x128xf32, #tpu.memory_space<vmem>>, %arg6: memref<8x128xf32, #tpu.memory_space<vmem>>, %arg7: memref<8x128xf32, #tpu.memory_space<vmem>>) attributes {dimension_semantics = [#tpu.dimension_semantics<parallel>, #tpu.dimension_semantics<parallel>, #tpu.dimension_semantics<arbitrary>], iteration_bounds = array<i64: 1, 1, 2>, scalar_prefetch = 0 : i64, scratch_operands = 1 : i64, tpu.core_type = #tpu.core_type<tc>, window_params = [{transform_indices = @transform_0, window_bounds = array<i64: 8, 512>}, {transform_indices = @transform_1, window_bounds = array<i64: 512, 128>}, {transform_indices = @transform_2, window_bounds = array<i64: 1, 128>}, {transform_indices = @transform_3, window_bounds = array<i64: 8, 128>}]} {
    %c0_i32 = arith.constant 0 : i32
    %0 = arith.cmpi eq, %arg2, %c0_i32 : i32
    %1 = arith.extui %0 : i1 to i32
    %c0_i32_0 = arith.constant 0 : i32
    %2 = arith.cmpi ne, %1, %c0_i32_0 : i32
    scf.if %2 {
      %cst_9 = arith.constant 0.000000e+00 : f32
      %12 = vector.broadcast %cst_9 : f32 to vector<8x128xf32>
      %c0_10 = arith.constant 0 : index
      %c0_11 = arith.constant 0 : index
      %13 = vector.load %arg7[%c0_10, %c0_11] : memref<8x128xf32, #tpu.memory_space<vmem>>, vector<8x128xf32>
      tpu.vector_store %arg7[%c0_10, %c0_11], %12 {strides = array<i32>} : memref<8x128xf32, #tpu.memory_space<vmem>>, vector<8x128xf32>,
    } else {
    }
    %c0 = arith.constant 0 : index
    %c0_1 = arith.constant 0 : index
    %3 = vector.load %arg7[%c0, %c0_1] : memref<8x128xf32, #tpu.memory_space<vmem>>, vector<8x128xf32>
    %c0_2 = arith.constant 0 : index
    %c0_3 = arith.constant 0 : index
    %4 = vector.load %arg3[%c0_2, %c0_3] : memref<8x512xbf16, #tpu.memory_space<vmem>>, vector<8x512xbf16>
    %c0_4 = arith.constant 0 : index
    %c0_5 = arith.constant 0 : index
    %5 = vector.load %arg4[%c0_4, %c0_5] : memref<512x128xbf16, #tpu.memory_space<vmem>>, vector<512x128xbf16>
    %cst = arith.constant dense<0.000000e+00> : vector<8x128xf32>
    %6 = tpu.matmul %4, %5, %cst {dimension_numbers = #tpu.dot_dimension_numbers<[1], [0], [0], [1], [0, 0, 1, 1], [], []>} : vector<8x512xbf16>, vector<512x128xbf16>, vector<8x128xf32> -> vector<8x128xf32>
    %7 = arith.addf %3, %6 : vector<8x128xf32>
    %c0_6 = arith.constant 0 : index
    %c0_7 = arith.constant 0 : index
    %8 = vector.load %arg7[%c0_6, %c0_7] : memref<8x128xf32, #tpu.memory_space<vmem>>, vector<8x128xf32>
    tpu.vector_store %arg7[%c0_6, %c0_7], %7 {strides = array<i32>} : memref<8x128xf32, #tpu.memory_space<vmem>>, vector<8x128xf32>,
    %c1_i32 = arith.constant 1 : i32
    %9 = arith.cmpi eq, %arg2, %c1_i32 : i32
    %10 = arith.extui %9 : i1 to i32
    %c0_i32_8 = arith.constant 0 : i32
    %11 = arith.cmpi ne, %10, %c0_i32_8 : i32
    scf.if %11 {
      %c0_9 = arith.constant 0 : index
      %c0_10 = arith.constant 0 : index
      %12 = vector.load %arg7[%c0_9, %c0_10] : memref<8x128xf32, #tpu.memory_space<vmem>>, vector<8x128xf32>
      %c0_11 = arith.constant 0 : index
      %c0_12 = arith.constant 0 : index
      %13 = vector.load %arg5[%c0_11, %c0_12] : memref<1x128xf32, #tpu.memory_space<vmem>>, vector<1x128xf32>
      %14 = vector.broadcast %13 : vector<1x128xf32> to vector<8x128xf32>
      %15 = arith.addf %12, %14 : vector<8x128xf32>
      %c0_13 = arith.constant 0 : index
      %c0_14 = arith.constant 0 : index
      %16 = vector.load %arg6[%c0_13, %c0_14] : memref<8x128xf32, #tpu.memory_space<vmem>>, vector<8x128xf32>
      tpu.vector_store %arg6[%c0_13, %c0_14], %15 {strides = array<i32>} : memref<8x128xf32, #tpu.memory_space<vmem>>, vector<8x128xf32>,
    } else {
    }
    return
  }
  func.func @transform_0(%arg0: i32, %arg1: i32, %arg2: i32) -> (i32, i32) {
    %c0_i32 = arith.constant 0 : i32
    return %arg0, %arg2 : i32, i32
  }
  func.func @transform_1(%arg0: i32, %arg1: i32, %arg2: i32) -> (i32, i32) {
    %c0_i32 = arith.constant 0 : i32
    return %arg2, %arg1 : i32, i32
  }
  func.func @transform_2(%arg0: i32, %arg1: i32, %arg2: i32) -> (i32, i32) {
    %c0_i32 = arith.constant 0 : i32
    %c0_i32_0 = arith.constant 0 : i32
    return %c0_i32, %arg1 : i32, i32
  }
  func.func @transform_3(%arg0: i32, %arg1: i32, %arg2: i32) -> (i32, i32) {
    %c0_i32 = arith.constant 0 : i32
    return %arg0, %arg1 : i32, i32
  }
}

</mosaic_0001>

<bundles_post_ra>
// kernel: tpu_custom_call.1
= control target key start
LH: loop header
LB: loop body
LE: loop exit
PB: predicated region body
PF: predicated region fallthrough
CT: control target
= control target key end

     0   :  { %8 = vsyncpa [#allocation4], 0  ;;  %s1313_s0 = inlined_call_operand.hbm [shape: bf16[8,1024], index: 0, kind: input, shape index: {}]   ;;  %s1314_s1 = inlined_call_operand.hbm [shape: bf16[1024,128], index: 1, kind: input, shape index: {}]   ;;  %s1315_s2 = inlined_call_operand.vmem [shape: f32[1,128], index: 2, kind: input, shape index: {}]   ;;  %s1316_s3 = inlined_call_operand.hbm [shape: f32[8,128], index: 3, kind: output, shape index: {}]  }
   0x1   :  { %10 = vsyncpa [#allocation4 + $0x1], 0 }
   0x2   :  { %11 = vsyncpa [#allocation7], 0 }
   0x3   :  { %13 = vsyncpa [#allocation7 + $0x1], 0 }
   0x4   :  { %14 = vsyncpa [#allocation5], 0  ;;  %s1128_s12 = smov 0   ;;  %s1130_s13 = smov 0  }
   0x5   :  { %s1132_s14 = smov 0   ;;  %s1134_s15 = smov 0  }
   0x6   :  { %s1136_s16 = smov 0   ;;  %s1138_s17 = smov 0  }
   0x7 LB: > { %s754_s18 = sadd.s32 4294967295, %s1100_s17   ;;  %s32_s19 = sadd.s32 1, %s1096_s16  ;;  %s1100_s17 = sphi %s1138_s17, %s20_s17   ;;  %s1096_s16 = sphi %s1136_s16, %s1326_s16   ;;  %s1092_s15 = sphi %s1134_s15, %s1325_s15   ;;  %s1088_s14 = sphi %s1132_s14, %s1324_s14   ;;  %s1084_s13 = sphi %s1130_s13, %s1323_s13   ;;  %s1080_s12 = sphi %s1128_s12, %s1322_s12  }
   0x8   : > { %p33_p0 = scmp.ge.s32.totalorder %s32_s19, 2  ;;  %s48_s20 = sadd.s32 1, %s1088_s14 }
   0x9   : > { %p55_p1 = scmp.ne.s32.totalorder %s1088_s14, %s1084_s13  ;;  %p56_p2 = scmp.eq.s32.totalorder %s1100_s17, 0 }
   0xa   : > { %s1328_s19 = smov (%p33_p0, %s32_s19), 0  ;;  %p61_p4 = scmp.ne.s32.totalorder %s1084_s13, %s1080_s12 }
   0xb   : > { %p1164_p3 = por %p56_p2, %p55_p1  ;;  %s44_s22 = ssub.s32 %s1096_s16, %s1328_s19 }
   0xc   : > { %p62_p5 = scmp.eq.s32.totalorder %s754_s18, 0  ;;  %p46_p6 = scmp.eq.s32.totalorder %s44_s22, 0 }
   0xd   : > { %p871_p8 = scmp.lt.s32.totalorder %s1100_s17, 2  ;;  %s1182_s25 = sand.u32 1, %s1088_s14  }
   0xe   : > { %p1173_p7 = por %p62_p5, %p61_p4  ;;  %s810_s26 = sshll.u32 %s1096_s16, 8 }
   0xf   : > { %s1179_s24 = scalar_select %p46_p6, %s1088_s14, %s48_s20  }
  0x10   : > { %s758_s27 = sshll.u32 %s1182_s25, 4  ;;  %s185_s30 = scalar_lea.hbm %s1313_s0, %s810_s26 }
  0x11   : > { %s177_s4 = scalar_lea.vmem [#allocation3], %s758_s27  ;;  %p1191_p9 = pnand %p871_p8, %p1164_p3 }
  0x12   : > { %s187_s5 = sshll.u32 %s177_s4, 4  ;;  %p764_p10 = scmp.ge.s32.totalorder %s1100_s17, 1  ;;  %s188_s5 = int_to_ptr.vmem [resolvable:$true] %s187_s5 }
  0x13   : > { %p214_p11 = scmp.lt.s32.totalorder %s1100_s17, 3  ;;  %s174_s7 = scalar_lea.sflag [#allocation4], %s1182_s25 }
  0x14   : > { %p964_p12 = pneg %p1191_p9  ;;  %s975_s8 = scalar_lea.vmem %s188_s5, 256 }
  0x15   : > { %p976_p13 = scmp.ne.s32.totalorder %s188_s5, %s975_s8  ;;  %s1102_s9 = smov [#allocation3]  }
  0x16   : > { %s980_s10 = sshll.u32 %s1102_s9, 4  ;;  %s981_s10 = int_to_ptr.vmem [resolvable:$false] %s980_s10 }
  0x17   : > { %p978_p0 = pnand %p976_p13, %p964_p12  ;;  %s982_s11 = scalar_lea.vmem %s981_s10, 512 }
  0x18   : > { %p983_p2 = scmp.lt.s32.totalorder %s188_s5, %s981_s10  ;;  %p984_p3 = scmp.lt.s32.totalorder %s982_s11, %s975_s8 }
  0x19   : > { %p979_p1 = pneg %p978_p0 }
  0x1a   : > { %p985_p4 = por %p984_p3, %p983_p2 }
  0x1c   : > { %p986_p5 = pnand %p985_p4, %p979_p1 }
  0x1e   : > { %989 = shalt.err (!%p986_p5)
}
  0x1f   : > { %867 = dma.hbm_to_vmem [thread:$0]  (!%p1191_p9), %s185_s30, 256, %s188_s5, %s174_s7  }
  0x20   : > { %p1209_p6 = pnand %p764_p10, %p214_p11  ;;  %s761_s20 = sshll.u32 %s1182_s25, 8 }
  0x21   : > { %s811_s21 = sshll.u32 %s1096_s16, 12  ;;  %s198_s28 = scalar_lea.vmem [#allocation6], %s761_s20 }
  0x22   : > { %s205_s27 = scalar_lea.hbm %s1314_s1, %s811_s21  ;;  %s206_s29 = sshll.u32 %s198_s28, 4  ;;  %s207_s29 = int_to_ptr.vmem [resolvable:$true] %s206_s29 }
  0x23   : > { %s195_s4 = scalar_lea.sflag [#allocation7], %s1182_s25  ;;  %s1003_s8 = scalar_lea.vmem %s207_s29, 4096 }
  0x24   : > { %p1004_p8 = scmp.ne.s32.totalorder %s207_s29, %s1003_s8  ;;  %s1103_s30 = smov [#allocation6]  }
  0x25   : > { %s1008_s5 = sshll.u32 %s1103_s30, 4  ;;  %s1009_s5 = int_to_ptr.vmem [resolvable:$false] %s1008_s5 }
  0x26   : > { %p1006_p13 = pnand %p1004_p8, %p964_p12  ;;  %s1010_s7 = scalar_lea.vmem %s1009_s5, 8192 }
  0x27   : > { %p1011_p10 = scmp.lt.s32.totalorder %s207_s29, %s1009_s5  ;;  %p1012_p11 = scmp.lt.s32.totalorder %s1010_s7, %s1003_s8 }
  0x28   : > { %p1007_p0 = pneg %p1006_p13 }
  0x29   : > { %p1013_p1 = por %p1012_p11, %p1011_p10 }
  0x2b   : > { %p1014_p2 = pnand %p1013_p1, %p1007_p0 }
  0x2d   : > { %1017 = shalt.err (!%p1014_p2)
}
  0x2e   : > { %s1104_s9 = smov 64   ;;  %s1105_s10 = smov 4  }
  0x2f   : > { %870 = dma.hbm_to_vmem [thread:$0]  (!%p1191_p9), %s205_s27, 4096, %s207_s29, %s195_s4, %s1104_s9, %s1104_s9, %s1105_s10  }
  0x30   : > { %218 = sbr.rel (%p1209_p6) target bundleno = 328 (0x148), region = 32  ;;  %s220_s25 = sand.u32 (!%p1209_p6), 1, %s1084_s13  }
  0x31   : > { %s765_s11 = sshll.u32 (!%p1209_p6), %s220_s25, 4  ;;  %s221_s20 = scalar_lea.sflag (!%p1209_p6), [#allocation4], %s220_s25 }
  0x32   : > { %s1227_s21 = scalar_lea.vmem (!%p1209_p6), [#allocation3], %s765_s11 }
  0x35   : > { %1067 = dma.done.wait (%p1173_p7), %s221_s20, 256  }
  0x36   : > { %1069 = vsyncadd (%p1173_p7), %s221_s20, 4294967040  ;;  %s766_s22 = sshll.u32 %s220_s25, 8  ;;  %s230_s26 = scalar_lea.sflag [#allocation7], %s220_s25 }
  0x37   : > { %s1233_s6 = scalar_lea.vmem [#allocation6], %s766_s22 }
  0x38   : > { %1071 = dma.done.wait (%p1173_p7), %s230_s26, 4096  }
  0x39   : > { %1073 = vsyncadd (%p1173_p7), %s230_s26, 4294963200  ;;  %p767_p9 = scmp.ne.s32.totalorder %s1092_s15, 0 }
  0x3b   : > { %268 = sbr.rel (%p767_p9) target bundleno = 66 (0x42), region = 44 }
  0x40   : > { %v1106_v0 = vmov 0.0  }
  0x41   : > { %269 = vst [vmem:[#allocation2] sm:$0xff] %v1106_v0 }
  0x42 PF: > { %v926_v1 = vld [vmem:[%s1233_s6 + $0x78] sm:$0xff]   ;;  %v930_v5 = vld [vmem:[%s1233_s6 + $0x70] sm:$0xff]   ;;  %v934_v9 = vld [vmem:[%s1233_s6 + $0x68] sm:$0xff]   ;;  %p804_p7 = scmp.ne.s32.totalorder %s1092_s15, 1 }
  0x43   : > { %v927_v2 = vld [vmem:[%s1233_s6 + $0xf8] sm:$0xff]   ;;  %812 = vmatprep.subr.bf16.mxu0 %v926_v1  ;;  %v931_v6 = vld [vmem:[%s1233_s6 + $0xf0] sm:$0xff]   ;;  %v935_v10 = vld [vmem:[%s1233_s6 + $0xe8] sm:$0xff]  }
  0x44   : > { %v928_v3 = vld [vmem:[%s1233_s6 + $0x38] sm:$0xff]   ;;  %834 = vmatprep.subr.bf16.mxu1 %v927_v2  ;;  %v932_v7 = vld [vmem:[%s1233_s6 + $0x30] sm:$0xff]   ;;  %v936_v11 = vld [vmem:[%s1233_s6 + $0x28] sm:$0xff]  }
  0x45   : > { %v929_v4 = vld [vmem:[%s1233_s6 + $0xb8] sm:$0xff]   ;;  %813 = vmatpush3.bf16.msra.mxu0 %v928_v3  ;;  %v933_v8 = vld [vmem:[%s1233_s6 + $0xb0] sm:$0xff]   ;;  %v937_v12 = vld [vmem:[%s1233_s6 + $0xa8] sm:$0xff]  }
  0x46   : > { %835 = vmatpush3.bf16.msra.mxu1 %v929_v4  ;;  %814 = vmatprep.subr.bf16.mxu0 %v930_v5  ;;  %v938_v13 = vld [vmem:[%s1233_s6 + $0x60] sm:$0xff]   ;;  %v942_v17 = vld [vmem:[%s1233_s6 + $0x58] sm:$0xff]   ;;  %v946_v21 = vld [vmem:[%s1233_s6 + $0x50] sm:$0xff]  }
  0x47   : > { %836 = vmatprep.subr.bf16.mxu1 %v931_v6  ;;  %v939_v14 = vld [vmem:[%s1233_s6 + $0xe0] sm:$0xff]   ;;  %v943_v18 = vld [vmem:[%s1233_s6 + $0xd8] sm:$0xff]   ;;  %v947_v22 = vld [vmem:[%s1233_s6 + $0xd0] sm:$0xff]  }
  0x48   : > { %v940_v15 = vld [vmem:[%s1233_s6 + $0x20] sm:$0xff]   ;;  %v944_v19 = vld [vmem:[%s1233_s6 + $0x18] sm:$0xff]   ;;  %v948_v23 = vld [vmem:[%s1233_s6 + $0x10] sm:$0xff]  }
  0x49   : > { %815 = vmatpush3.bf16.msra.mxu0 %v932_v7  ;;  %v941_v16 = vld [vmem:[%s1233_s6 + $0xa0] sm:$0xff]   ;;  %v945_v20 = vld [vmem:[%s1233_s6 + $0x98] sm:$0xff]   ;;  %v949_v24 = vld [vmem:[%s1233_s6 + $0x90] sm:$0xff]  }
  0x4a   : > { %837 = vmatpush3.bf16.msra.mxu1 %v933_v8  ;;  %816 = vmatprep.subr.bf16.mxu0 %v934_v9  ;;  %v950_v25 = vld [vmem:[%s1233_s6 + $0x48] sm:$0xff]   ;;  %v954_v29 = vld [vmem:[%s1233_s6 + $0x40] sm:$0xff]   ;;  %v270_v45 = vld [vmem:[#allocation2] sm:$0xff] }
  0x4b   : > { %838 = vmatprep.subr.bf16.mxu1 %v935_v10  ;;  %v951_v26 = vld [vmem:[%s1233_s6 + $0xc8] sm:$0xff]   ;;  %v955_v30 = vld [vmem:[%s1233_s6 + $0xc0] sm:$0xff]  }
  0x4c   : > { %v952_v27 = vld [vmem:[%s1233_s6 + $0x8] sm:$0xff]   ;;  %v956_v31 = vld [vmem:[%s1233_s6] sm:$0xff]  }
  0x4d   : > { %817 = vmatpush3.bf16.msra.mxu0 %v936_v11  ;;  %v953_v28 = vld [vmem:[%s1233_s6 + $0x88] sm:$0xff]   ;;  %v957_v32 = vld [vmem:[%s1233_s6 + $0x80] sm:$0xff]  }
  0x4e   : > { %839 = vmatpush3.bf16.msra.mxu1 %v937_v12  ;;  %818 = vmatprep.subr.bf16.mxu0 %v938_v13  ;;  %v271_v33 = vld [vmem:[%s1227_s21] sm:$0xff]  ;;  %v272_v34 = vld [vmem:[%s1227_s21 + $0x8] sm:$0xff] }
  0x4f   : > { %840 = vmatprep.subr.bf16.mxu1 %v939_v14  ;;  %v768_v35 = vcombine.low %v271_v33, %v271_v33  ;;  %v769_v36 = vcombine.high %v271_v33, %v271_v33  ;;  %v770_v37 = vcombine.low %v272_v34, %v272_v34  ;;  %v771_v38 = vcombine.high %v272_v34, %v272_v34 }
  0x51   : > { %819 = vmatpush3.bf16.msra.mxu0 %v940_v15  ;;  %575 = vmatprep.mubr.bf16.mxu0 %v769_v36 }
  0x52   : > { %841 = vmatpush3.bf16.msra.mxu1 %v941_v16  ;;  %820 = vmatprep.subr.bf16.mxu0 %v942_v17 }
  0x53   : > { %842 = vmatprep.subr.bf16.mxu1 %v943_v18  ;;  %615 = vmatprep.mubr.bf16.mxu1 %v771_v38 }
  0x55   : > { %821 = vmatpush3.bf16.msra.mxu0 %v944_v19 }
  0x56   : > { %843 = vmatpush3.bf16.msra.mxu1 %v945_v20  ;;  %822 = vmatprep.subr.bf16.mxu0 %v946_v21 }
  0x57   : > { %844 = vmatprep.subr.bf16.mxu1 %v947_v22 }
  0x59   : > { %823 = vmatpush3.bf16.msra.mxu0 %v948_v23 }
  0x5a   : > { %845 = vmatpush3.bf16.msra.mxu1 %v949_v24  ;;  %824 = vmatprep.subr.bf16.mxu0 %v950_v25 }
  0x5b   : > { %846 = vmatprep.subr.bf16.mxu1 %v951_v26 }
  0x5d   : > { %825 = vmatpush3.bf16.msra.mxu0 %v952_v27 }
  0x5e   : > { %847 = vmatpush3.bf16.msra.mxu1 %v953_v28  ;;  %826 = vmatprep.subr.bf16.mxu0 %v954_v29 }
  0x5f   : > { %848 = vmatprep.subr.bf16.mxu1 %v955_v30 }
  0x61   : > { %827 = vmatpush3.bf16.msra.mxu0 %v956_v31 }
  0x62   : > { %849 = vmatpush3.bf16.msra.mxu1 %v957_v32 }
  0x64   : > { %576 = vmatmul.mubr.bf16.vlgmr.msra.gmra.mxu0 %v768_v35 }
  0x65   : > { %616 = vmatmul.mubr.bf16.vlgmr.msra.gmra.mxu1 %v770_v37 }
 0x124   : > { %v828_v39 = vpop.f32.mrf.mxu0 }
 0x125   : > { %v850_v40 = vpop.f32.mrf.mxu1 }
 0x126   : > { %v829_v41 = vpop.f32.mrf.mxu0 }
 0x127   : > { %v851_v42 = vpop.f32.mrf.mxu1  ;;  %v830_v43 = vadd.f32 %v829_v41, %v828_v39 }
 0x128   : > { %v852_v44 = vadd.f32 %v851_v42, %v850_v40  ;;  %v831_v46 = vpop.f32.mrf.mxu0 }
 0x129   : > { %v853_v47 = vpop.f32.mrf.mxu1 }
 0x12a   : > { %v618_v48 = vadd.f32 %v852_v44, %v830_v43  ;;  %v832_v49 = vpop.f32.mrf.mxu0  ;;  %628 = sbr.rel (%p804_p7) target bundleno = 313 (0x139), region = 48 }
 0x12b   : > { %v854_v50 = vpop.f32.mrf.mxu1 }
 0x12c   : > { %v623_v51 = vadd.f32 %v618_v48, %v270_v45 }
 0x12e   : > { %624 = vst [vmem:[#allocation2] sm:$0xff] %v623_v51 }
 0x12f   : > { %v805_v53 = vld [vmem:[%s1315_s2] ss:$0 sm:$0xff] }
 0x135   : > { %v629_v52 = vld [vmem:[#allocation2] sm:$0xff] }
 0x136   : > { %v637_v54 = vadd.f32 %v805_v53, %v629_v52 }
 0x138   : > { %638 = vst [vmem:[#allocation8] sm:$0xff] %v637_v54 }
 0x139 PF: > { %p1280_p12 = scmp.eq.s32.totalorder %s754_s18, 1  ;;  %s1107_s28 = smov [#allocation8]  }
 0x13a   : > { %s649_s29 = sshll.u32 %s1107_s28, 4  ;;  %s650_s29 = int_to_ptr.vmem [resolvable:$true] %s649_s29 }
 0x13b   : > { %s1018_s15 = scalar_lea.vmem %s650_s29, 128  ;;  %p1025_p6 = scmp.lt.s32.totalorder %s650_s29, %s650_s29 }
 0x13c   : > { %p1019_p3 = scmp.ne.s32.totalorder %s650_s29, %s1018_s15  ;;  %p1026_p8 = scmp.lt.s32.totalorder %s1018_s15, %s1018_s15 }
 0x13e   : > { %p1020_p4 = pnand %p1019_p3, %p1280_p12  ;;  %p1027_p13 = por %p1026_p8, %p1025_p6 }
 0x140   : > { %p1021_p5 = pneg %p1020_p4 }
 0x142   : > { %p1028_p0 = pnand %p1027_p13, %p1021_p5 }
 0x144   : > { %1031 = shalt.err (!%p1028_p0)
}
 0x145   : > { %861 = dma.vmem_to_hbm [thread:$0]  (%p1280_p12), %s650_s29, 128, %s1316_s3, [#allocation5]  }
 0x146   : > { %1075 = dma.done.wait (%p1280_p12), [#allocation5], 128  }
 0x147   : > { %1077 = vsyncadd (%p1280_p12), [#allocation5], 4294967168 }
 0x148 PF: > { %s20_s17 = sadd.s32 1, %s1100_s17   ;;  %s1322_s12 = smov %s1084_s13 }
 0x149   : > { %p17_p10 = scmp.ge.s32.totalorder %s20_s17, 4   ;;  %s1323_s13 = smov %s1088_s14 }
 0x14a   : > { %s1324_s14 = smov %s1179_s24  ;;  %s1325_s15 = smov %s1096_s16 }
 0x14b   : > { %s1326_s16 = smov %s1328_s19  ;;  %19 = sbr.rel (!%p17_p10) target bundleno = 7 (0x7), region = 94 }
 0x150   :  { %662 = vsyncpa [#allocation4], 1 }
 0x151   :  { %664 = vsyncpa [#allocation4 + $0x1], 1 }
 0x152   :  { %665 = vsyncpa [#allocation7], 1 }
 0x153   :  { %667 = vsyncpa [#allocation7 + $0x1], 1 }
 0x154   :  { %668 = vsyncpa [#allocation5], 1 }
 0x155   :  { %670 = vsyncpa [#allocation5 + $0x1], 1 }

</bundles_post_ra>
